<compile_context>
chip_gen: v7x
topology: tpu7x:2x2x1
jax: 0.10.0
libtpu: 0.0.40
codegen_flags: <defaults>
</compile_context>

<pallas_src>
import math

import jax
import jax.numpy as jnp
from jax.experimental import pallas as pl
from jax.experimental.pallas import tpu as pltpu

D_IN = 50      # tex_latent feature dim
D_HID = 128    # hidden width
D_OUT = 9      # exposure dim (-> 3x3 affine)

K_PAD = 64     # 50 -> 64 : aligned contraction dim for the first matmul
OUT_PAD = 128  # 9 -> 128 : lane-dense output tile


def _round_up(x, m):
    return (x + m - 1) // m * m


# ----------------------------------------------------------------------------
# Pallas kernel: Linear(50->128) + ReLU + Linear(128->9), fused, one tile of
# `tm` rows per grid step. Weights arrive padded / bf16; biases are f32.
# ----------------------------------------------------------------------------
def _calib_mlp_kernel(x_ref, w1_ref, b1_ref, w2_ref, b2_ref, out_ref):
    # x: (tm, 64) bf16, w1: (64, 128) bf16 -> f32 accumulate on the MXU
    h = jnp.dot(x_ref[...], w1_ref[...], preferred_element_type=jnp.float32)
    h = jnp.maximum(h + b1_ref[...], 0.0)                 # f32 bias-add + ReLU
    # second matmul in bf16 as well, f32 accumulate
    y = jnp.dot(h.astype(w2_ref.dtype), w2_ref[...],
                preferred_element_type=jnp.float32)
    out_ref[...] = (y + b2_ref[...]).astype(out_ref.dtype)  # (tm, 128) f32


# ----------------------------------------------------------------------------
# One-time parameter packing: pad to tile-aligned shapes, cast weights to bf16.
# ----------------------------------------------------------------------------
def pack_params(w1, b1, w2, b2):
    w1p = jnp.zeros((K_PAD, D_HID), jnp.bfloat16).at[:D_IN, :].set(
        w1.astype(jnp.bfloat16))
    b1p = b1.reshape(1, D_HID).astype(jnp.float32)
    w2p = jnp.zeros((D_HID, OUT_PAD), jnp.bfloat16).at[:, :D_OUT].set(
        w2.astype(jnp.bfloat16))
    b2p = jnp.zeros((1, OUT_PAD), jnp.float32).at[:, :D_OUT].set(
        b2.reshape(1, D_OUT).astype(jnp.float32))
    return w1p, b1p, w2p, b2p


# ----------------------------------------------------------------------------
# Batched exposure: (N, 50) f32 -> (N, 9) f32. Amortizes launch/DMA overhead.
# ----------------------------------------------------------------------------
def calibration_mlp_apply(tex_latent, packed):
    w1p, b1p, w2p, b2p = packed
    n = tex_latent.shape[0]

    # Row tile: fill an MXU-sized tile when the batch allows it, otherwise the
    # smallest bf16-packed sublane multiple that covers the batch.
    tm = 128 if n >= 128 else _round_up(max(n, 1), 16)
    n_pad = _round_up(n, tm)

    # Zero-pad rows and the 50->64 feature dim; cast activations to bf16.
    x = jnp.zeros((n_pad, K_PAD), jnp.bfloat16)
    x = x.at[:n, :D_IN].set(tex_latent.astype(jnp.bfloat16))

    out = pl.pallas_call(
        _calib_mlp_kernel,
        out_shape=jax.ShapeDtypeStruct((n_pad, OUT_PAD), jnp.float32),
        grid=(n_pad // tm,),
        in_specs=[
            pl.BlockSpec((tm, K_PAD), lambda i: (i, 0)),       # x rows
            pl.BlockSpec((K_PAD, D_HID), lambda i: (0, 0)),    # w1 (resident)
            pl.BlockSpec((1, D_HID), lambda i: (0, 0)),        # b1
            pl.BlockSpec((D_HID, OUT_PAD), lambda i: (0, 0)),  # w2 (resident)
            pl.BlockSpec((1, OUT_PAD), lambda i: (0, 0)),      # b2
        ],
        out_specs=pl.BlockSpec((tm, OUT_PAD), lambda i: (i, 0)),
        compiler_params=pltpu.CompilerParams(
            dimension_semantics=("parallel",)),                # v7x: 2 TCs
    )(x, w1p, b1p, w2p, b2p)

    return out[:n, :D_OUT]


# ----------------------------------------------------------------------------
# Module-semantic forward: (1, 50) -> (3, 3). The reshape requires batch == 1.
# ----------------------------------------------------------------------------
def calibration_mlp_forward(tex_latent, packed):
    exposure = calibration_mlp_apply(tex_latent, packed)
    return exposure[:, :D_OUT].reshape(3, 3)


# ----------------------------------------------------------------------------
# Deterministic parameter init mirroring the PyTorch module
# (xavier_uniform weights, default-Linear uniform biases), f32, [in, out].
# ----------------------------------------------------------------------------
def _xavier_uniform(key, fan_in, fan_out):
    bound = math.sqrt(6.0 / (fan_in + fan_out))
    return jax.random.uniform(key, (fan_in, fan_out), jnp.float32, -bound, bound)


def _bias_init(key, fan_in, fan_out):
    bound = 1.0 / math.sqrt(float(fan_in))
    return jax.random.uniform(key, (1, fan_out), jnp.float32, -bound, bound)


def make_params(key):
    k1, k2, k3, k4 = jax.random.split(key, 4)
    w1 = _xavier_uniform(k1, D_IN, D_HID)
    b1 = _bias_init(k2, D_IN, D_HID)
    w2 = _xavier_uniform(k3, D_HID, D_OUT)
    b2 = _bias_init(k4, D_HID, D_OUT)
    return w1, b1, w2, b2


if __name__ == "__main__":
    key = jax.random.PRNGKey(0)
    k_params, k_x, k_batch = jax.random.split(key, 3)

    w1, b1, w2, b2 = make_params(k_params)
    packed = pack_params(w1, b1, w2, b2)

    # Plain-JAX reference with the same precision policy as the kernel
    # (bf16 matmul operands, f32 accumulation, f32 bias-add / ReLU).
    def ref(x):
        h = jnp.dot(x.astype(jnp.bfloat16), w1.astype(jnp.bfloat16),
                    preferred_element_type=jnp.float32) + b1
        h = jnp.maximum(h, 0.0)
        return jnp.dot(h.astype(jnp.bfloat16), w2.astype(jnp.bfloat16),
                       preferred_element_type=jnp.float32) + b2

    # --- module-semantic call (batch must be 1 for the (3, 3) reshape) ------
    tex_latent = jax.random.normal(k_x, (1, D_IN), jnp.float32)
    affine = jax.block_until_ready(calibration_mlp_forward(tex_latent, packed))
    ref_affine = ref(tex_latent)[:, :D_OUT].reshape(3, 3)
    assert affine.shape == (3, 3)
    assert jnp.allclose(affine, ref_affine, atol=1e-3, rtol=1e-3)

    # --- batched call (amortizes launch/DMA overhead; non-multiple batch) ---
    xb = jax.random.normal(k_batch, (37, D_IN), jnp.float32)
    exposure_b = jax.block_until_ready(calibration_mlp_apply(xb, packed))
    assert exposure_b.shape == (37, D_OUT)
    assert jnp.allclose(exposure_b, ref(xb)[:, :D_OUT], atol=1e-3, rtol=1e-3)

    print("KERNEL_OK")
</pallas_src>

<mosaic_0001>
module attributes {stable_mosaic.version = 11 : i64} {
  func.func @_calib_mlp_kernel(%arg0: i32, %arg1: memref<16x64xbf16, #tpu.memory_space<vmem>>, %arg2: memref<64x128xbf16, #tpu.memory_space<vmem>>, %arg3: memref<1x128xf32, #tpu.memory_space<vmem>>, %arg4: memref<128x128xbf16, #tpu.memory_space<vmem>>, %arg5: memref<1x128xf32, #tpu.memory_space<vmem>>, %arg6: memref<16x128xf32, #tpu.memory_space<vmem>>) attributes {dimension_semantics = [#tpu.dimension_semantics<parallel>], iteration_bounds = array<i64: 1>, scalar_prefetch = 0 : i64, scratch_operands = 0 : i64, tpu.core_type = #tpu.core_type<tc>, window_params = [{transform_indices = @transform_0, window_bounds = array<i64: 16, 64>}, {pipeline_mode = #tpu.pipeline_mode<synchronous>, transform_indices = @transform_1, window_bounds = array<i64: 64, 128>}, {pipeline_mode = #tpu.pipeline_mode<synchronous>, transform_indices = @transform_2, window_bounds = array<i64: 1, 128>}, {pipeline_mode = #tpu.pipeline_mode<synchronous>, transform_indices = @transform_3, window_bounds = array<i64: 128, 128>}, {pipeline_mode = #tpu.pipeline_mode<synchronous>, transform_indices = @transform_4, window_bounds = array<i64: 1, 128>}, {transform_indices = @transform_5, window_bounds = array<i64: 16, 128>}]} {
    %c0 = arith.constant 0 : index
    %c0_0 = arith.constant 0 : index
    %0 = vector.load %arg1[%c0, %c0_0] : memref<16x64xbf16, #tpu.memory_space<vmem>>, vector<16x64xbf16>
    %c0_1 = arith.constant 0 : index
    %c0_2 = arith.constant 0 : index
    %1 = vector.load %arg2[%c0_1, %c0_2] : memref<64x128xbf16, #tpu.memory_space<vmem>>, vector<64x128xbf16>
    %cst = arith.constant dense<0.000000e+00> : vector<16x128xf32>
    %2 = tpu.matmul %0, %1, %cst {dimension_numbers = #tpu.dot_dimension_numbers<[1], [0], [0], [1], [0, 0, 1, 1], [], []>} : vector<16x64xbf16>, vector<64x128xbf16>, vector<16x128xf32> -> vector<16x128xf32>
    %c0_3 = arith.constant 0 : index
    %c0_4 = arith.constant 0 : index
    %3 = vector.load %arg3[%c0_3, %c0_4] : memref<1x128xf32, #tpu.memory_space<vmem>>, vector<1x128xf32>
    %4 = vector.broadcast %3 : vector<1x128xf32> to vector<16x128xf32>
    %5 = arith.addf %2, %4 : vector<16x128xf32>
    %cst_5 = arith.constant 0.000000e+00 : f32
    %6 = vector.broadcast %cst_5 : f32 to vector<16x128xf32>
    %7 = arith.maximumf %5, %6 : vector<16x128xf32>
    %8 = arith.truncf %7 : vector<16x128xf32> to vector<16x128xbf16>
    %c0_6 = arith.constant 0 : index
    %c0_7 = arith.constant 0 : index
    %9 = vector.load %arg4[%c0_6, %c0_7] : memref<128x128xbf16, #tpu.memory_space<vmem>>, vector<128x128xbf16>
    %cst_8 = arith.constant dense<0.000000e+00> : vector<16x128xf32>
    %10 = tpu.matmul %8, %9, %cst_8 {dimension_numbers = #tpu.dot_dimension_numbers<[1], [0], [0], [1], [0, 0, 1, 1], [], []>} : vector<16x128xbf16>, vector<128x128xbf16>, vector<16x128xf32> -> vector<16x128xf32>
    %c0_9 = arith.constant 0 : index
    %c0_10 = arith.constant 0 : index
    %11 = vector.load %arg5[%c0_9, %c0_10] : memref<1x128xf32, #tpu.memory_space<vmem>>, vector<1x128xf32>
    %12 = vector.broadcast %11 : vector<1x128xf32> to vector<16x128xf32>
    %13 = arith.addf %10, %12 : vector<16x128xf32>
    %c0_11 = arith.constant 0 : index
    %c0_12 = arith.constant 0 : index
    %14 = vector.load %arg6[%c0_11, %c0_12] : memref<16x128xf32, #tpu.memory_space<vmem>>, vector<16x128xf32>
    tpu.vector_store %arg6[%c0_11, %c0_12], %13 {strides = array<i32>} : memref<16x128xf32, #tpu.memory_space<vmem>>, vector<16x128xf32>,
    return
  }
  func.func @transform_0(%arg0: i32) -> (i32, i32) {
    %c0_i32 = arith.constant 0 : i32
    %c0_i32_0 = arith.constant 0 : i32
    return %arg0, %c0_i32 : i32, i32
  }
  func.func @transform_1(%arg0: i32) -> (i32, i32) {
    %c0_i32 = arith.constant 0 : i32
    %c0_i32_0 = arith.constant 0 : i32
    %c0_i32_1 = arith.constant 0 : i32
    return %c0_i32, %c0_i32_0 : i32, i32
  }
  func.func @transform_2(%arg0: i32) -> (i32, i32) {
    %c0_i32 = arith.constant 0 : i32
    %c0_i32_0 = arith.constant 0 : i32
    %c0_i32_1 = arith.constant 0 : i32
    return %c0_i32, %c0_i32_0 : i32, i32
  }
  func.func @transform_3(%arg0: i32) -> (i32, i32) {
    %c0_i32 = arith.constant 0 : i32
    %c0_i32_0 = arith.constant 0 : i32
    %c0_i32_1 = arith.constant 0 : i32
    return %c0_i32, %c0_i32_0 : i32, i32
  }
  func.func @transform_4(%arg0: i32) -> (i32, i32) {
    %c0_i32 = arith.constant 0 : i32
    %c0_i32_0 = arith.constant 0 : i32
    %c0_i32_1 = arith.constant 0 : i32
    return %c0_i32, %c0_i32_0 : i32, i32
  }
  func.func @transform_5(%arg0: i32) -> (i32, i32) {
    %c0_i32 = arith.constant 0 : i32
    %c0_i32_0 = arith.constant 0 : i32
    return %arg0, %c0_i32 : i32, i32
  }
}

</mosaic_0001>

<bundles_post_ra>
// kernel: tpu_custom_call.1
= control target key start
LH: loop header
LB: loop body
LE: loop exit
PB: predicated region body
PF: predicated region fallthrough
CT: control target
= control target key end

     0   :  { %10 = vsyncpa [#allocation3], 0  ;;  %s578_s0 = inlined_call_operand.hbm [shape: bf16[16,64], index: 0, kind: input, shape index: {}]   ;;  %s579_s1 = inlined_call_operand.hbm [shape: bf16[64,128], index: 1, kind: input, shape index: {}]   ;;  %s580_s2 = inlined_call_operand.vmem [shape: f32[1,128], index: 2, kind: input, shape index: {}]   ;;  %s581_s3 = inlined_call_operand.hbm [shape: bf16[128,128], index: 3, kind: input, shape index: {}]   ;;  %s582_s4 = inlined_call_operand.vmem [shape: f32[1,128], index: 4, kind: input, shape index: {}]   ;;  %s583_s5 = inlined_call_operand.hbm [shape: f32[16,128], index: 5, kind: output, shape index: {}]  }
   0x1   :  { %11 = vsyncpa [#allocation6], 0 }
   0x2   :  { %12 = vsyncpa [#allocation4], 0  ;;  %s468_s18 = smov [#allocation5]   ;;  %s469_s20 = smov [#allocation2]  }
   0x3   :  { %s30_s19 = sshll.u32 %s468_s18, 4  ;;  %s18_s21 = sshll.u32 %s469_s20, 4  ;;  %s31_s19 = int_to_ptr.vmem [resolvable:$true] %s30_s19  ;;  %s508_s21 = int_to_ptr.vmem [resolvable:$true] %s18_s21 }
   0x4   :  { %s374_s24 = scalar_lea.hbm %s579_s1, 512 }
   0x5   :  { %p375_p0 = scmp.ne.s32.totalorder %s579_s1, %s374_s24  ;;  %p378_p1 = scmp.lt.u32.totalorder %s374_s24, %s579_s1 }
   0x7   :  { %p380_p2 = pnand %p378_p1, %p375_p0 }
   0x9   :  { %383 = shalt.err (!%p380_p2)
}
   0xa   :  { %s384_s29 = scalar_lea.vmem %s31_s19, 512  ;;  %p389_p4 = scmp.lt.s32.totalorder %s31_s19, %s31_s19 }
   0xb   :  { %p385_p3 = scmp.ne.s32.totalorder %s31_s19, %s384_s29  ;;  %p390_p5 = scmp.lt.s32.totalorder %s384_s29, %s384_s29 }
   0xd   :  { %p391_p6 = por %p390_p5, %p389_p4 }
   0xf   :  { %p392_p7 = pnand %p391_p6, %p385_p3 }
  0x11   :  { %395 = shalt.err (!%p392_p7)
}
  0x12   :  { %s470_s30 = smov 64   ;;  %s471_s6 = smov 4  }
  0x13   :  { %36 = dma.hbm_to_vmem [thread:$0]  %s579_s1, 512, %s31_s19, [#allocation6], %s470_s30, %s470_s30, %s471_s6  }
  0x14   :  { %s396_s11 = scalar_lea.hbm %s578_s0, 128 }
  0x15   :  { %p397_p8 = scmp.ne.s32.totalorder %s578_s0, %s396_s11  ;;  %p400_p9 = scmp.lt.u32.totalorder %s396_s11, %s578_s0 }
  0x17   :  { %p402_p10 = pnand %p400_p9, %p397_p8 }
  0x19   :  { %405 = shalt.err (!%p402_p10)
}
  0x1a   :  { %s406_s16 = scalar_lea.vmem %s508_s21, 128  ;;  %p411_p12 = scmp.lt.s32.totalorder %s508_s21, %s508_s21 }
  0x1b   :  { %p407_p11 = scmp.ne.s32.totalorder %s508_s21, %s406_s16  ;;  %p412_p13 = scmp.lt.s32.totalorder %s406_s16, %s406_s16 }
  0x1d   :  { %p413_p0 = por %p412_p13, %p411_p12 }
  0x1f   :  { %p414_p1 = pnand %p413_p0, %p407_p11 }
  0x21   :  { %417 = shalt.err (!%p414_p1)
}
  0x22   :  { %24 = dma.hbm_to_vmem [thread:$0]  %s578_s0, 128, %s508_s21, [#allocation3], %s470_s30, %s470_s30, %s471_s6  }
  0x23   :  { %s472_s18 = smov [#allocation7]   ;;  %s418_s23 = scalar_lea.hbm %s581_s3, 1024 }
  0x24   :  { %s44_s19 = sshll.u32 %s472_s18, 4  ;;  %p419_p2 = scmp.ne.s32.totalorder %s581_s3, %s418_s23  ;;  %s45_s19 = int_to_ptr.vmem [resolvable:$true] %s44_s19 }
  0x25   :  { %p422_p3 = scmp.lt.u32.totalorder %s418_s23, %s581_s3 }
  0x27   :  { %p424_p4 = pnand %p422_p3, %p419_p2 }
  0x29   :  { %427 = shalt.err (!%p424_p4)
}
  0x2a   :  { %s428_s28 = scalar_lea.vmem %s45_s19, 1024  ;;  %p433_p6 = scmp.lt.s32.totalorder %s45_s19, %s45_s19 }
  0x2b   :  { %p429_p5 = scmp.ne.s32.totalorder %s45_s19, %s428_s28  ;;  %p434_p7 = scmp.lt.s32.totalorder %s428_s28, %s428_s28 }
  0x2d   :  { %p435_p8 = por %p434_p7, %p433_p6 }
  0x2f   :  { %p436_p9 = pnand %p435_p8, %p429_p5 }
  0x31   :  { %439 = shalt.err (!%p436_p9)
}
  0x32   :  { %50 = dma.hbm_to_vmem [thread:$0]  %s581_s3, 1024, %s45_s19, [#allocation6], %s470_s30, %s470_s30, %s471_s6  }
  0x33   :  { %462 = dma.done.wait [#allocation3], 128  }
  0x34   :  { %463 = vsyncadd [#allocation3], 4294967168 }
  0x35   :  { %464 = dma.done.wait [#allocation6], 1536  }
  0x36   :  { %465 = vsyncadd [#allocation6], 4294965760  ;;  %v473_v0 = vmov 0.0   ;;  %vm474_vm0 = vmmov 0   ;;  %v361_v1 = vld [vmem:[#allocation5] sm:$0xff]   ;;  %v362_v2 = vld [vmem:[#allocation5 + $0x8] sm:$0xff]  }
  0x37   :  { %319 = vmatprep.subr.bf16.mxu0 %v473_v0  ;;  %327 = vmatprep.mubr.msk.bf16.mxu0 %vm474_vm0, %v473_v0  ;;  %v366_v3 = vld [vmem:[#allocation7] sm:$0xff]   ;;  %v363_v4 = vld [vmem:[#allocation5 + $0x10] sm:$0xff]   ;;  %v367_v5 = vld [vmem:[#allocation7 + $0x8] sm:$0xff]   ;;  %vm109_vm1 = vcmask 523264   ;;  %s475_s7 = smov [#allocation8]  }
  0x38   :  { %331 = vmatprep.subr.bf16.mxu1 %v473_v0  ;;  %347 = vmatprep.mubr.msk.bf16.mxu1 %vm474_vm0, %v473_v0  ;;  %v364_v6 = vld [vmem:[#allocation5 + $0x18] sm:$0xff]   ;;  %v368_v7 = vld [vmem:[#allocation7 + $0x10] sm:$0xff]   ;;  %v370_v10 = vld [vmem:[#allocation7 + $0x20] sm:$0xff]   ;;  %s276_s8 = sshll.u32 %s475_s7, 4  ;;  %s277_s8 = int_to_ptr.vmem [resolvable:$true] %s276_s8 }
  0x39   :  { %320 = vmatpush3.bf16.msra.mxu0 %v361_v1  ;;  %332 = vmatpush3.bf16.msra.mxu1 %v366_v3  ;;  %v365_v8 = vld [vmem:[#allocation2] sm:$0xff]   ;;  %v371_v11 = vld [vmem:[#allocation7 + $0x28] sm:$0xff]   ;;  %v372_v12 = vld [vmem:[#allocation7 + $0x30] sm:$0xff]   ;;  %p445_p11 = scmp.lt.s32.totalorder %s277_s8, %s277_s8 }
  0x3a   :  { %321 = vmatprep.subr.bf16.mxu0 %v473_v0  ;;  %333 = vmatprep.subr.bf16.mxu1 %v473_v0  ;;  %v369_v9 = vld [vmem:[#allocation7 + $0x18] sm:$0xff]  }
  0x3b   :  { %v373_v13 = vld [vmem:[#allocation7 + $0x38] sm:$0xff]  }
  0x3c   :  { %v289_v14 = vld [vmem:[%s580_s2] ss:$0 sm:$0xff]  ;;  %s440_s2 = scalar_lea.vmem %s277_s8, 256 }
  0x3d   :  { %322 = vmatpush3.bf16.msra.mxu0 %v362_v2  ;;  %334 = vmatpush3.bf16.msra.mxu1 %v367_v5  ;;  %v296_v24 = vld [vmem:[%s582_s4] ss:$0 sm:$0xff]  ;;  %p441_p10 = scmp.ne.s32.totalorder %s277_s8, %s440_s2  ;;  %p446_p12 = scmp.lt.s32.totalorder %s440_s2, %s440_s2 }
  0x3e   :  { %323 = vmatprep.subr.bf16.mxu0 %v473_v0  ;;  %335 = vmatprep.subr.bf16.mxu1 %v473_v0 }
  0x3f   :  { %p447_p13 = por %p446_p12, %p445_p11 }
  0x41   :  { %324 = vmatpush3.bf16.msra.mxu0 %v363_v4  ;;  %336 = vmatpush3.bf16.msra.mxu1 %v368_v7  ;;  %p448_p0 = pnand %p447_p13, %p441_p10 }
  0x42   :  { %325 = vmatprep.subr.bf16.mxu0 %v473_v0  ;;  %337 = vmatprep.subr.bf16.mxu1 %v473_v0 }
  0x45   :  { %326 = vmatpush3.bf16.msra.mxu0 %v364_v6  ;;  %338 = vmatpush3.bf16.msra.mxu1 %v369_v9 }
  0x46   :  { %339 = vmatprep.subr.bf16.mxu1 %v473_v0 }
  0x48   :  { %328 = vmatmul.mubr.msk.bf16.vlgmr.msra.gmra.mrb[0].mxu0 %vm109_vm1, %v365_v8 }
  0x49   :  { %340 = vmatpush3.bf16.msra.mxu1 %v370_v10 }
  0x4a   :  { %341 = vmatprep.subr.bf16.mxu1 %v473_v0 }
  0x4d   :  { %342 = vmatpush3.bf16.msra.mxu1 %v371_v11 }
  0x4e   :  { %343 = vmatprep.subr.bf16.mxu1 %v473_v0 }
  0x51   :  { %344 = vmatpush3.bf16.msra.mxu1 %v372_v12 }
  0x52   :  { %345 = vmatprep.subr.bf16.mxu1 %v473_v0 }
  0x55   :  { %346 = vmatpush3.bf16.msra.mxu1 %v373_v13 }
 0x11b   :  { %v147_v15 = vpop.f32.mrb[0].mxu0 }
 0x11c   :  { %v148_v16 = vadd.f32 %v289_v14, %v147_v15  ;;  %v329_v17 = vpop.f32.mrb[1].mxu0 }
 0x11d   :  { %v150_v18 = vpop.f32.mrb[2].mxu0 }
 0x11e   :  { %v151_v19 = vadd.f32 %v289_v14, %v150_v18  ;;  %v330_v20 = vpop.f32.mrb[3].mxu0  ;;  %v154_v21 = vmax.f32 %v148_v16, 0.0 }
 0x120   :  { %v155_v22 = vmax.f32 %v151_v19, 0.0 }
 0x122   :  { %v156_v23 = vpack.c.bf16 %v155_v22, %v154_v21 }
 0x124   :  { %348 = vmatmul.mubr.bf16.vlgmr.msra.gmra.mrb[0].mxu1 %v156_v23 }
 0x1f7   :  { %v262_v25 = vpop.f32.mrb[0].mxu1 }
 0x1f8   :  { %v263_v26 = vadd.f32 %v296_v24, %v262_v25  ;;  %v349_v27 = vpop.f32.mrb[1].mxu1 }
 0x1f9   :  { %v265_v28 = vpop.f32.mrb[2].mxu1 }
 0x1fa   :  { %269 = vst [vmem:[#allocation8] sm:$0xff] %v263_v26  ;;  %v266_v29 = vadd.f32 %v296_v24, %v265_v28  ;;  %v350_v30 = vpop.f32.mrb[3].mxu1 }
 0x1fc   :  { %270 = vst [vmem:[#allocation8 + $0x8] sm:$0xff] %v266_v29 }
 0x1fd   :  { %451 = shalt.err (!%p448_p0)
}
 0x1fe   :  { %s452_s10 = scalar_lea.hbm %s583_s5, 256 }
 0x1ff   :  { %p453_p1 = scmp.ne.s32.totalorder %s583_s5, %s452_s10  ;;  %p456_p2 = scmp.lt.u32.totalorder %s452_s10, %s583_s5 }
 0x201   :  { %p458_p3 = pnand %p456_p2, %p453_p1 }
 0x203   :  { %461 = shalt.err (!%p458_p3)
}
 0x204   :  { %s476_s15 = smov 128   ;;  %s477_s16 = smov 8  }
 0x205   :  { %282 = dma.vmem_to_hbm [thread:$0]  %s277_s8, 256, %s583_s5, [#allocation4], %s476_s15, %s476_s15, %s477_s16  }
 0x206   :  { %466 = dma.done.wait [#allocation4], 256  }
 0x207   :  { %467 = vsyncadd [#allocation4], 4294967040 }
 0x208   :  { %286 = vsyncpa [#allocation3], 1 }
 0x209   :  { %287 = vsyncpa [#allocation6], 1 }
 0x20a   :  { %288 = vsyncpa [#allocation4], 1 }

</bundles_post_ra>
